<compile_context>
chip_gen: v5e
topology: v5e:2x2
jax: 0.10.0
libtpu: 0.0.40
codegen_flags: <defaults>
</compile_context>

<pallas_src>
import jax
import jax.numpy as jnp
from jax.experimental import pallas as pl
from jax.experimental.pallas import tpu as pltpu

PREFIX_ROWS = 180
FEAT = 144          # per-half feature size; full linear input is 2 * FEAT = 288
PAD = 256           # lane-padded width of the packed parameter buffer


def crime_prompt_kernel(idx_ref, params_ref, emb_ref, o_ref):
    """out[i] = pv[idx[i]] + emb[i] . w2   (bias already folded into pv).

    idx_ref    : VMEM (B, 1)    int32  row indices into pre_fix (column)
    params_ref : VMEM (2, 256)  f32    row 0 = pv (lanes 0..179, bias folded,
                                       rest zero); row 1 = w2 (lanes 0..143)
    emb_ref    : VMEM (B, 144)  f32    embedding input
    o_ref      : VMEM (B, 1)    f32    output
    """
    B = o_ref.shape[0]
    idx = idx_ref[...]                                           # (B, 1)
    params = params_ref[...]                                     # (2, 256)

    pv = params[0:1, :]                                          # (1, 256)
    w2 = params[1:2, :FEAT]                                      # (1, 144)

    # "Gather" pv[idx[i]]: VPU compare/select over (B, 256) + one XLU lane
    # reduce.  No dynamic sublane indexing -> no serialized row copies; an
    # out-of-range index selects nothing (contributes 0 incl. folded bias,
    # documented deviation from PyTorch, which would raise).
    lane = jax.lax.broadcasted_iota(jnp.int32, (B, PAD), 1)      # (B, 256)
    gathered = jnp.sum(jnp.where(lane == idx, pv, 0.0),
                       axis=-1, keepdims=True)                   # (B, 1)

    # emb half of the concat-matmul as VPU multiply + lane reduce (MXU with an
    # N=1 RHS would be pure push/pop latency at <1% utilization).
    contrib = jnp.sum(emb_ref[...] * w2,
                      axis=-1, keepdims=True)                    # (B, 1)

    o_ref[...] = gathered + contrib


def prepare_params(pre_fix, lin_weight, lin_bias):
    """One-time (per parameter update) precompute, hoisted out of the call path.

    Returns a single packed (2, 256) f32 buffer:
      row 0, lanes [0:180) : pre_fix @ W[:, :144].T + bias   (pv, bias folded)
      row 1, lanes [0:144) : W[:, 144:]                      (w2)
    remaining lanes are zero padding.
    """
    w1_row = lin_weight[:, :FEAT]                                # (1, 144)
    w2_row = lin_weight[:, FEAT:]                                # (1, 144)
    pv = jnp.sum(pre_fix * w1_row, axis=-1) + lin_bias[0]        # (180,)
    params = jnp.zeros((2, PAD), dtype=jnp.float32)
    params = params.at[0, :PREFIX_ROWS].set(pv.astype(jnp.float32))
    params = params.at[1, :FEAT].set(w2_row[0].astype(jnp.float32))
    return params


def crime_prompt_forward(index, emb, params):
    """index: (B,) int, emb: (B, 144) f32, params: packed (2, 256) f32.

    Returns (B, 1) f32.
    """
    B = emb.shape[0]
    idx_col = index.astype(jnp.int32).reshape(B, 1)

    # Tiny, memory-light op: tell XLA so it doesn't serialize neighbors.
    cost = pl.CostEstimate(
        flops=B * (PREFIX_ROWS + 2 * FEAT),
        transcendentals=0,
        bytes_accessed=B * 4 + B * FEAT * 4 + B * 4 + 2 * PAD * 4,
    )

    return pl.pallas_call(
        crime_prompt_kernel,
        out_shape=jax.ShapeDtypeStruct((B, 1), jnp.float32),
        in_specs=[
            pl.BlockSpec(memory_space=pltpu.MemorySpace.VMEM),   # idx column
            pl.BlockSpec(memory_space=pltpu.MemorySpace.VMEM),   # packed params
            pl.BlockSpec(memory_space=pltpu.MemorySpace.VMEM),   # emb
        ],
        out_specs=pl.BlockSpec(memory_space=pltpu.MemorySpace.VMEM),
        cost_estimate=cost,
        # TODO(synk): if B ever scales, add a batch grid with row tiles in
        # multiples of 8 (TB ~512-2048 sized against scoped VMEM: 32 MiB on
        # v6e/v7x, 16 MiB on v5e), dimension_semantics=("parallel",) for v7x's
        # two TensorCores, a lane-dense (1, B) output (avoids vst.msk partial
        # stores), and lane-dense or scalar-prefetched indices.
    )(idx_col, params, emb)


def reference_forward(index, emb, pre_fix, lin_weight, lin_bias):
    tmp = jnp.concatenate([pre_fix[index], emb], axis=1)            # (B, 288)
    return jnp.dot(tmp, lin_weight.T,
                   precision=jax.lax.Precision.HIGHEST) + lin_bias  # (B, 1)


if __name__ == "__main__":
    key = jax.random.PRNGKey(0)
    k_w, k_b, k_pf, k_emb, k_idx = jax.random.split(key, 5)

    B = 8
    # Deterministic "parameters" matching the module's __init__ shapes.
    weight = jax.random.normal(k_w, (1, FEAT), dtype=jnp.float32)       # passed-in weight
    b = jax.random.normal(k_b, (1,), dtype=jnp.float32)                 # passed-in bias
    pre_fix = jax.random.normal(k_pf, (PREFIX_ROWS, FEAT), dtype=jnp.float32)
    lin_weight = jnp.concatenate([weight, weight], axis=1)              # (1, 288)

    # Forward inputs.
    emb = jax.random.normal(k_emb, (B, FEAT), dtype=jnp.float32)        # (8, 144)
    index = jax.random.randint(k_idx, (B,), 0, PREFIX_ROWS, dtype=jnp.int32)

    # Parameter-only precompute (kept out of the per-call path; must be rerun
    # after any update to pre_fix / weight / bias).
    params = prepare_params(pre_fix, lin_weight, b)

    out = crime_prompt_forward(index, emb, params)
    out = jax.block_until_ready(out)

    ref = reference_forward(index, emb, pre_fix, lin_weight, b)
    assert out.shape == (B, 1)
    assert jnp.allclose(out, ref, atol=1e-4, rtol=1e-4), (out, ref)

    print("KERNEL_OK")
</pallas_src>

<mosaic_0001>
module attributes {stable_mosaic.version = 11 : i64} {
  func.func @crime_prompt_kernel(%arg0: memref<8x1xi32, #tpu.memory_space<vmem>>, %arg1: memref<2x256xf32, #tpu.memory_space<vmem>>, %arg2: memref<8x144xf32, #tpu.memory_space<vmem>>, %arg3: memref<8x1xf32, #tpu.memory_space<vmem>>) attributes {dimension_semantics = [], scalar_prefetch = 0 : i64, scratch_operands = 0 : i64, tpu.core_type = #tpu.core_type<tc>} {
    %c0 = arith.constant 0 : index
    %c0_0 = arith.constant 0 : index
    %0 = vector.load %arg0[%c0, %c0_0] : memref<8x1xi32, #tpu.memory_space<vmem>>, vector<8x1xi32>
    %c0_1 = arith.constant 0 : index
    %c0_2 = arith.constant 0 : index
    %1 = vector.load %arg1[%c0_1, %c0_2] : memref<2x256xf32, #tpu.memory_space<vmem>>, vector<2x256xf32>
    %2 = vector.extract_strided_slice %1 {offsets = [0, 0], sizes = [1, 256], strides = [1, 1]} : vector<2x256xf32> to vector<1x256xf32>
    %3 = vector.extract_strided_slice %1 {offsets = [1, 0], sizes = [1, 144], strides = [1, 1]} : vector<2x256xf32> to vector<1x144xf32>
    %4 = tpu.iota {dimensions = array<i32: 1>} : vector<8x256xi32>
    %5 = vector.broadcast %0 : vector<8x1xi32> to vector<8x256xi32>
    %6 = arith.cmpi eq, %4, %5 : vector<8x256xi32>
    %cst = arith.constant 0.000000e+00 : f32
    %7 = vector.shape_cast %2 : vector<1x256xf32> to vector<1x256xf32>
    %8 = vector.broadcast %7 : vector<1x256xf32> to vector<8x256xf32>
    %9 = vector.broadcast %cst : f32 to vector<8x256xf32>
    %10 = arith.select %6, %8, %9 : vector<8x256xi1>, vector<8x256xf32>
    %cst_3 = arith.constant dense<0.000000e+00> : vector<8xf32>
    %11 = vector.multi_reduction <add>, %10, %cst_3 [1] : vector<8x256xf32> to vector<8xf32>
    %12 = vector.shape_cast %11 : vector<8xf32> to vector<8x1xf32>
    %c0_4 = arith.constant 0 : index
    %c0_5 = arith.constant 0 : index
    %13 = vector.load %arg2[%c0_4, %c0_5] : memref<8x144xf32, #tpu.memory_space<vmem>>, vector<8x144xf32>
    %14 = vector.broadcast %3 : vector<1x144xf32> to vector<8x144xf32>
    %15 = arith.mulf %13, %14 : vector<8x144xf32>
    %cst_6 = arith.constant dense<0.000000e+00> : vector<8xf32>
    %16 = vector.multi_reduction <add>, %15, %cst_6 [1] : vector<8x144xf32> to vector<8xf32>
    %17 = vector.shape_cast %16 : vector<8xf32> to vector<8x1xf32>
    %18 = arith.addf %12, %17 : vector<8x1xf32>
    %c0_7 = arith.constant 0 : index
    %c0_8 = arith.constant 0 : index
    %19 = vector.load %arg3[%c0_7, %c0_8] : memref<8x1xf32, #tpu.memory_space<vmem>>, vector<8x1xf32>
    tpu.vector_store %arg3[%c0_7, %c0_8], %18 {strides = array<i32>} : memref<8x1xf32, #tpu.memory_space<vmem>>, vector<8x1xf32>,
    return
  }
}

</mosaic_0001>

<bundles_post_ra>
// kernel: tpu_custom_call.1
= control target key start
LH: loop header
LB: loop body
LE: loop exit
PB: predicated region body
PF: predicated region fallthrough
CT: control target
= control target key end

     0   :  { %8 = vsyncpa [#allocation3], 0  ;;  %s102_s15 = smov [#allocation2]   ;;  %s136_s0 = inlined_call_operand.vmem [shape: s32[8,1], index: 0, kind: input, shape index: {}]   ;;  %s137_s1 = inlined_call_operand.vmem [shape: f32[2,256], index: 1, kind: input, shape index: {}]   ;;  %s138_s2 = inlined_call_operand.hbm [shape: f32[8,144], index: 2, kind: input, shape index: {}]   ;;  %s139_s3 = inlined_call_operand.vmem [shape: f32[8,1], index: 3, kind: output, shape index: {}]  }
   0x1   :  { %s18_s14 = sshll.u32 %s138_s2, 4  ;;  %s20_s16 = sshll.u32 %s102_s15, 4  ;;  %s19_s14 = int_to_ptr.hbm [resolvable:$true] %s18_s14  ;;  %s21_s16 = int_to_ptr.vmem [resolvable:$true] %s20_s16 }
   0x2   :  { %23 = dma.hbm_to_vmem [thread:$0]  %s19_s14, 256, %s21_s16, [#allocation3]  }
   0x3   :  { %100 = dma.done.wait [#allocation3], 256  }
   0x4   :  { %101 = vsyncadd [#allocation3], 4294967040  ;;  %v103_v0 = vmov 0   ;;  %v28_v1 = vld [vmem:[%s136_s0] sm:$0xff]  ;;  %v51_v6 = vld [vmem:[#allocation2 + $0x8] sm:$0xff]  ;;  %vm60_vm0 = vcmask 130048   ;;  %v30_v13 = vlaneseq }
   0x5   :  { %75 = vset.pattern.permute.xlu0 %v103_v0  ;;  %v29_v2 = vld [vmem:[%s137_s1] sm:$0xf]  ;;  %vm66_vm3 = vcmask 7168  }
   0x6   :  { %34 = vperm.xlu0 %75, %v28_v1   ;;  %v53_v3 = vperm.slane %v29_v2, 3  ;;  %v52_v4 = vperm.slane %v29_v2, 1  ;;  %v50_v8 = vld [vmem:[#allocation2] sm:$0xff]  ;;  %v31_v14 = vand.u32 127, %v30_v13  ;;  %v39_v15 = vperm.slane %v29_v2, 0 }
   0x7   :  { %v40_v16 = vperm.slane %v29_v2, 2 }
   0x8   :  { %v57_v5 = vperm.slane %v53_v3, 1  ;;  %v56_v7 = vperm.slane %v52_v4, 1  ;;  %v32_v17 = vadd.s32 128, %v31_v14  ;;  %v43_v18 = vperm.slane %v39_v15, 0 }
   0x9   :  { %v44_v19 = vperm.slane %v40_v16, 0 }
   0xa   :  { %v59_v9 = vmul.f32 %v57_v5, %v51_v6  ;;  %v58_v10 = vmul.f32 %v56_v7, %v50_v8 }
   0xc   :  { %v61_v11 = vsel %vm60_vm0, %v59_v9, 0.0 }
   0xd   :  { %v62_v12 = vadd.f32 %v61_v11, %v58_v10 }
   0xf   :  { %63 = vadd.xlane.f32.xlu1 %v62_v12 }
  0x78   :  { %v35_v20 = vpop.permute.xlu0 %34 }
  0x79   :  { %vm36_vm1 = vcmp.eq.s32.totalorder %v31_v14, %v35_v20  ;;  %vm37_vm2 = vcmp.eq.s32.totalorder %v32_v17, %v35_v20 }
  0x7a   :  { %v45_v21 = vsel %vm36_vm1, %v43_v18, 0.0  ;;  %v46_v22 = vsel %vm37_vm2, %v44_v19, 0.0 }
  0x7b   :  { %v47_v23 = vadd.f32 %v46_v22, %v45_v21 }
  0x7d   :  { %48 = vadd.xlane.f32.xlu0 %v47_v23 }
  0x82   :  { %v64_v24 = vpop.xlane.xlu1 %63 }
  0xf0   :  { %v49_v25 = vpop.xlane.xlu0 %48 }
  0xf1   :  { %v65_v26 = vadd.f32 %v64_v24, %v49_v25 }
  0xf3   :  { %67 = vst.msk [vmem:[%s139_s3] sm:$0xff] %vm66_vm3, %v65_v26 }
  0xf4   :  { %72 = vsyncpa [#allocation3], 1 }

</bundles_post_ra>
